<compile_context>
chip_gen: v5e
topology: v5e:2x2
jax: 0.10.0
libtpu: 0.0.40
codegen_flags: <defaults>
</compile_context>

<pallas_src>
import functools

import jax
import jax.numpy as jnp
from jax.experimental import pallas as pl
from jax.experimental.pallas import tpu as pltpu


def _spec(shape):
    """Whole-array block for a trivial grid=(1,)."""
    n = len(shape)
    return pl.BlockSpec(shape, lambda i, n=n: (0,) * n)


# ----------------------------------------------------------------------------
# Fused kernel: 3x GCNConv (+ReLU on first two) on the lane-packed triplet,
# global_mean_pool, dropout(identity in eval), lin0, pairwise distances,
# cat+Linear(H,1)+Sigmoid.  Single grid step, everything VMEM-resident.
# ----------------------------------------------------------------------------
def _fused_gcn_triplet_kernel(a_ref, xc_ref, w1_ref, wslab_ref, pool_ref,
                              slab_ref, out_ref):
    A = a_ref[...]                                   # (N, N) normalized adjacency
    H3 = w1_ref.shape[1]                             # 3*H
    H = H3 // 3
    H2 = H // 2
    H23 = 3 * H2

    # Packed small-parameter slab (8, 128): one DMA instead of seven.
    slab = slab_ref[...]
    b1 = slab[0:1, 0:H3]
    b2 = slab[1:2, 0:H3]
    b3 = slab[2:3, 0:H3]
    bl0 = slab[3:4, 0:H23]
    wa = slab[4:5, 0:H2]
    wb = slab[5:6, 0:H2]
    blin = slab[6:7, 0:1]

    # Packed H-input weights: [blockdiag(w2) | blockdiag(w3) | blockdiag(wl0)].
    wslab = wslab_ref[...]                           # (3H, 6H + 3H2)
    w2 = wslab[:, 0:H3]
    w3 = wslab[:, H3:2 * H3]
    wl0 = wslab[:, 2 * H3:2 * H3 + H23]

    # Layer 0: GCNConv(F, H) + relu on all three branches at once.
    # Aggregate first: (A @ Xc) @ blockdiag(W1) — identical math, K dim 3F << 3H.
    ax = jnp.dot(A, xc_ref[...], preferred_element_type=jnp.float32)        # (N, 3F)
    h = jnp.dot(ax, w1_ref[...], preferred_element_type=jnp.float32) + b1   # (N, 3H)
    h = jnp.maximum(h, 0.0)

    # Layer 1: GCNConv(H, H) + relu (lane-packed).
    h = jnp.dot(h, w2, preferred_element_type=jnp.float32)
    h = jnp.dot(A, h, preferred_element_type=jnp.float32) + b2
    h = jnp.maximum(h, 0.0)

    # Layer 2: GCNConv(H, H), no relu.
    h = jnp.dot(h, w3, preferred_element_type=jnp.float32)
    h = jnp.dot(A, h, preferred_element_type=jnp.float32) + b3

    # global_mean_pool via pooling matrix P (B, N); still lane-packed.
    g = jnp.dot(pool_ref[...], h, preferred_element_type=jnp.float32)       # (B, 3H)

    # F.dropout(p=0.5, training=False) -> identity (eval mode).

    # lin0: Linear(H, H/2) per branch via block-diagonal weight.
    e = jnp.dot(g, wl0, preferred_element_type=jnp.float32) + bl0           # (B, 3H2)

    # ---- triplet head ----
    e0 = e[:, 0:H2]
    e1 = e[:, H2:2 * H2]
    e2 = e[:, 2 * H2:3 * H2]

    eps = 1e-6  # torch F.pairwise_distance default eps (added per-coordinate)
    d_p = jnp.sqrt(jnp.sum((e0 - e1 + eps) ** 2, axis=1, keepdims=True))    # (B,1)
    d_n = jnp.sqrt(jnp.sum((e0 - e2 + eps) ** 2, axis=1, keepdims=True))    # (B,1)

    # lin(cat(e0, ek)) == sum(e0*wa) + sum(ek*wb) + b ; VPU mul + lane-reduce,
    # shared e0 term computed once.
    t0 = jnp.sum(e0 * wa, axis=1, keepdims=True)                            # (B,1)
    lp = t0 + jnp.sum(e1 * wb, axis=1, keepdims=True) + blin
    ln = t0 + jnp.sum(e2 * wb, axis=1, keepdims=True) + blin
    sp = jax.nn.sigmoid(lp)
    sn = jax.nn.sigmoid(ln)

    # One merged output: [e0 | e1 | e2 | d_p | d_n | score_p | score_n]
    out_ref[...] = jnp.concatenate([e, d_p, d_n, sp, sn], axis=1)           # (B, 3H2+4)


def fused_gcn_triplet(a_norm, xc, pool, packed):
    B = pool.shape[0]
    H3 = packed["w1b"].shape[1]
    H2 = (H3 // 3) // 2
    out_w = 3 * H2 + 4
    ins = (a_norm, xc, packed["w1b"], packed["w_slab"], pool, packed["slab"])
    return pl.pallas_call(
        _fused_gcn_triplet_kernel,
        out_shape=jax.ShapeDtypeStruct((B, out_w), jnp.float32),
        grid=(1,),
        in_specs=[_spec(a.shape) for a in ins],
        out_specs=_spec((B, out_w)),
        compiler_params=pltpu.CompilerParams(dimension_semantics=("arbitrary",)),
    )(*ins)


# ----------------------------------------------------------------------------
# One-time parameter packing (hoisted out of the per-forward path).
# ----------------------------------------------------------------------------
def _block_diag3(w):
    r, c = w.shape
    z = jnp.zeros((r, c), w.dtype)
    return jnp.concatenate([
        jnp.concatenate([w, z, z], axis=1),
        jnp.concatenate([z, w, z], axis=1),
        jnp.concatenate([z, z, w], axis=1)], axis=0)


def pack_params(params):
    """Build block-diag weights + one (8,128) small-parameter slab, ONCE at init."""
    H = params["w1"].shape[1]
    H2 = params["wl0"].shape[1]
    assert 3 * H <= 128, "slab layout assumes 3*hidden <= 128 lanes"
    w1b = _block_diag3(params["w1"])                                   # (3F, 3H)
    w_slab = jnp.concatenate([_block_diag3(params["w2"]),
                              _block_diag3(params["w3"]),
                              _block_diag3(params["wl0"])], axis=1)    # (3H, 6H+3H2)
    slab = jnp.zeros((8, 128), jnp.float32)
    slab = slab.at[0, :3 * H].set(jnp.tile(params["b1"][0], 3))
    slab = slab.at[1, :3 * H].set(jnp.tile(params["b2"][0], 3))
    slab = slab.at[2, :3 * H].set(jnp.tile(params["b3"][0], 3))
    slab = slab.at[3, :3 * H2].set(jnp.tile(params["bl0"][0], 3))
    slab = slab.at[4, :H2].set(params["wlin"][:H2, 0])
    slab = slab.at[5, :H2].set(params["wlin"][H2:, 0])
    slab = slab.at[6, 0].set(params["blin"][0, 0])
    return {"w1b": w1b, "w_slab": w_slab, "slab": slab}


# ----------------------------------------------------------------------------
# Plain-JAX glue: GCN normalized adjacency, mean-pool matrix, params, forward.
# ----------------------------------------------------------------------------
def build_gcn_norm_adj(edge_index, num_nodes):
    """PyG gcn_norm: scatter-add weights, add_remaining_self_loops, D^-1/2 A D^-1/2."""
    src, dst = edge_index[0], edge_index[1]
    A = jnp.zeros((num_nodes, num_nodes), jnp.float32).at[dst, src].add(1.0)
    idx = jnp.arange(num_nodes)
    diag = A[idx, idx]
    # only nodes WITHOUT an existing self loop get an added weight-1 self loop
    A = A.at[idx, idx].set(jnp.where(diag == 0.0, 1.0, diag))
    deg = jnp.sum(A, axis=1)
    dinv = jnp.where(deg > 0, jax.lax.rsqrt(deg), 0.0)
    return dinv[:, None] * A * dinv[None, :]


def build_mean_pool(batch, num_graphs):
    onehot = (batch[None, :] == jnp.arange(num_graphs)[:, None]).astype(jnp.float32)
    counts = jnp.maximum(jnp.sum(onehot, axis=1, keepdims=True), 1.0)
    return onehot / counts                       # (B, N)


def init_params(key, f_in, hidden):
    h2 = hidden // 2
    ks = jax.random.split(key, 10)
    s = 0.1
    return {
        "w1": s * jax.random.normal(ks[0], (f_in, hidden), jnp.float32),
        "b1": jnp.zeros((1, hidden), jnp.float32),
        "w2": s * jax.random.normal(ks[1], (hidden, hidden), jnp.float32),
        "b2": jnp.zeros((1, hidden), jnp.float32),
        "w3": s * jax.random.normal(ks[2], (hidden, hidden), jnp.float32),
        "b3": jnp.zeros((1, hidden), jnp.float32),
        "wl0": s * jax.random.normal(ks[3], (hidden, h2), jnp.float32),
        "bl0": s * jax.random.normal(ks[4], (1, h2), jnp.float32),
        "wlin": s * jax.random.normal(ks[5], (2 * h2, 1), jnp.float32),
        "blin": s * jax.random.normal(ks[6], (1, 1), jnp.float32),
    }


@functools.partial(jax.jit, static_argnums=(6,))
def gcn_triplet_forward(packed, x0, x1, x2, edge_index, batch, num_graphs):
    a_norm = build_gcn_norm_adj(edge_index, x0.shape[0])
    pool = build_mean_pool(batch, num_graphs)
    xc = jnp.concatenate([x0, x1, x2], axis=1)          # lane-pack the triplet inputs

    out = fused_gcn_triplet(a_norm, xc, pool, packed)   # (B, 3*H2 + 4)

    H2 = (packed["w1b"].shape[1] // 3) // 2
    e0 = out[:, 0:H2]
    e1 = out[:, H2:2 * H2]
    e2 = out[:, 2 * H2:3 * H2]
    d_p = out[:, 3 * H2]
    d_n = out[:, 3 * H2 + 1]
    score_p = out[:, 3 * H2 + 2:3 * H2 + 3]
    score_n = out[:, 3 * H2 + 3:3 * H2 + 4]
    # tiny reductions replace the original Python counting loops
    correct = jnp.sum(d_n - d_p > 0.0).astype(jnp.int32).reshape((1,))
    correct_score = jnp.sum(score_p[:, 0] - score_n[:, 0] > 0.0).astype(jnp.int32).reshape((1,))
    return e0, e1, e2, correct, score_p, score_n, correct_score


if __name__ == "__main__":
    F_IN, HIDDEN = 4, 32          # dataset.num_node_features, hidden_channels
    NODES_PER_GRAPH, NUM_GRAPHS = 8, 2
    N = NODES_PER_GRAPH * NUM_GRAPHS

    key = jax.random.PRNGKey(0)
    kx0, kx1, kx2, kp = jax.random.split(key, 4)
    x0 = jax.random.normal(kx0, (N, F_IN), jnp.float32)
    x1 = jax.random.normal(kx1, (N, F_IN), jnp.float32)
    x2 = jax.random.normal(kx2, (N, F_IN), jnp.float32)

    # simple symmetric chain graph within each of the two graphs in the batch
    src, dst = [], []
    for g in range(NUM_GRAPHS):
        base = g * NODES_PER_GRAPH
        for i in range(NODES_PER_GRAPH - 1):
            src += [base + i, base + i + 1]
            dst += [base + i + 1, base + i]
    edge_index = jnp.array([src, dst], dtype=jnp.int32)
    batch = jnp.array([g for g in range(NUM_GRAPHS)
                       for _ in range(NODES_PER_GRAPH)], dtype=jnp.int32)

    params = init_params(kp, F_IN, HIDDEN)
    packed = pack_params(params)   # one-time packing, hoisted out of the forward

    outs = gcn_triplet_forward(packed, x0, x1, x2, edge_index, batch, NUM_GRAPHS)
    outs = jax.block_until_ready(outs)
    e0, e1, e2, correct, score_p, score_n, correct_score = outs
    assert e0.shape == (NUM_GRAPHS, HIDDEN // 2)
    assert e1.shape == (NUM_GRAPHS, HIDDEN // 2)
    assert e2.shape == (NUM_GRAPHS, HIDDEN // 2)
    assert score_p.shape == (NUM_GRAPHS, 1) and score_n.shape == (NUM_GRAPHS, 1)
    assert correct.shape == (1,) and correct.dtype == jnp.int32
    assert correct_score.shape == (1,) and correct_score.dtype == jnp.int32
    print("KERNEL_OK")
</pallas_src>

<mosaic_0001>
module attributes {stable_mosaic.version = 11 : i64} {
  func.func @_fused_gcn_triplet_kernel(%arg0: i32, %arg1: memref<16x16xf32, #tpu.memory_space<vmem>>, %arg2: memref<16x12xf32, #tpu.memory_space<vmem>>, %arg3: memref<12x96xf32, #tpu.memory_space<vmem>>, %arg4: memref<96x240xf32, #tpu.memory_space<vmem>>, %arg5: memref<2x16xf32, #tpu.memory_space<vmem>>, %arg6: memref<8x128xf32, #tpu.memory_space<vmem>>, %arg7: memref<2x52xf32, #tpu.memory_space<vmem>>) attributes {dimension_semantics = [#tpu.dimension_semantics<arbitrary>], iteration_bounds = array<i64: 1>, scalar_prefetch = 0 : i64, scratch_operands = 0 : i64, tpu.core_type = #tpu.core_type<tc>, window_params = [{pipeline_mode = #tpu.pipeline_mode<synchronous>, transform_indices = @transform_0, window_bounds = array<i64: 16, 16>}, {pipeline_mode = #tpu.pipeline_mode<synchronous>, transform_indices = @transform_1, window_bounds = array<i64: 16, 12>}, {pipeline_mode = #tpu.pipeline_mode<synchronous>, transform_indices = @transform_2, window_bounds = array<i64: 12, 96>}, {pipeline_mode = #tpu.pipeline_mode<synchronous>, transform_indices = @transform_3, window_bounds = array<i64: 96, 240>}, {pipeline_mode = #tpu.pipeline_mode<synchronous>, transform_indices = @transform_4, window_bounds = array<i64: 2, 16>}, {pipeline_mode = #tpu.pipeline_mode<synchronous>, transform_indices = @transform_5, window_bounds = array<i64: 8, 128>}, {pipeline_mode = #tpu.pipeline_mode<synchronous>, transform_indices = @transform_6, window_bounds = array<i64: 2, 52>}]} {
    %c0 = arith.constant 0 : index
    %c0_0 = arith.constant 0 : index
    %0 = vector.load %arg1[%c0, %c0_0] : memref<16x16xf32, #tpu.memory_space<vmem>>, vector<16x16xf32>
    %c0_1 = arith.constant 0 : index
    %c0_2 = arith.constant 0 : index
    %1 = vector.load %arg6[%c0_1, %c0_2] : memref<8x128xf32, #tpu.memory_space<vmem>>, vector<8x128xf32>
    %2 = vector.extract_strided_slice %1 {offsets = [0, 0], sizes = [1, 96], strides = [1, 1]} : vector<8x128xf32> to vector<1x96xf32>
    %3 = vector.extract_strided_slice %1 {offsets = [1, 0], sizes = [1, 96], strides = [1, 1]} : vector<8x128xf32> to vector<1x96xf32>
    %4 = vector.extract_strided_slice %1 {offsets = [2, 0], sizes = [1, 96], strides = [1, 1]} : vector<8x128xf32> to vector<1x96xf32>
    %5 = vector.extract_strided_slice %1 {offsets = [3, 0], sizes = [1, 48], strides = [1, 1]} : vector<8x128xf32> to vector<1x48xf32>
    %6 = vector.extract_strided_slice %1 {offsets = [4, 0], sizes = [1, 16], strides = [1, 1]} : vector<8x128xf32> to vector<1x16xf32>
    %7 = vector.extract_strided_slice %1 {offsets = [5, 0], sizes = [1, 16], strides = [1, 1]} : vector<8x128xf32> to vector<1x16xf32>
    %8 = vector.extract_strided_slice %1 {offsets = [6, 0], sizes = [1, 1], strides = [1, 1]} : vector<8x128xf32> to vector<1x1xf32>
    %c0_3 = arith.constant 0 : index
    %c0_4 = arith.constant 0 : index
    %9 = vector.load %arg4[%c0_3, %c0_4] : memref<96x240xf32, #tpu.memory_space<vmem>>, vector<96x240xf32>
    %10 = vector.extract_strided_slice %9 {offsets = [0, 0], sizes = [96, 96], strides = [1, 1]} : vector<96x240xf32> to vector<96x96xf32>
    %11 = vector.extract_strided_slice %9 {offsets = [0, 96], sizes = [96, 96], strides = [1, 1]} : vector<96x240xf32> to vector<96x96xf32>
    %12 = vector.extract_strided_slice %9 {offsets = [0, 192], sizes = [96, 48], strides = [1, 1]} : vector<96x240xf32> to vector<96x48xf32>
    %c0_5 = arith.constant 0 : index
    %c0_6 = arith.constant 0 : index
    %13 = vector.load %arg2[%c0_5, %c0_6] : memref<16x12xf32, #tpu.memory_space<vmem>>, vector<16x12xf32>
    %cst = arith.constant dense<0.000000e+00> : vector<16x12xf32>
    %14 = tpu.matmul %0, %13, %cst {dimension_numbers = #tpu.dot_dimension_numbers<[1], [0], [0], [1], [0, 0, 1, 1], [], []>} : vector<16x16xf32>, vector<16x12xf32>, vector<16x12xf32> -> vector<16x12xf32>
    %c0_7 = arith.constant 0 : index
    %c0_8 = arith.constant 0 : index
    %15 = vector.load %arg3[%c0_7, %c0_8] : memref<12x96xf32, #tpu.memory_space<vmem>>, vector<12x96xf32>
    %cst_9 = arith.constant dense<0.000000e+00> : vector<16x96xf32>
    %16 = tpu.matmul %14, %15, %cst_9 {dimension_numbers = #tpu.dot_dimension_numbers<[1], [0], [0], [1], [0, 0, 1, 1], [], []>} : vector<16x12xf32>, vector<12x96xf32>, vector<16x96xf32> -> vector<16x96xf32>
    %17 = vector.broadcast %2 : vector<1x96xf32> to vector<16x96xf32>
    %18 = arith.addf %16, %17 : vector<16x96xf32>
    %cst_10 = arith.constant 0.000000e+00 : f32
    %19 = vector.broadcast %cst_10 : f32 to vector<16x96xf32>
    %20 = arith.maximumf %18, %19 : vector<16x96xf32>
    %cst_11 = arith.constant dense<0.000000e+00> : vector<16x96xf32>
    %21 = tpu.matmul %20, %10, %cst_11 {dimension_numbers = #tpu.dot_dimension_numbers<[1], [0], [0], [1], [0, 0, 1, 1], [], []>} : vector<16x96xf32>, vector<96x96xf32>, vector<16x96xf32> -> vector<16x96xf32>
    %cst_12 = arith.constant dense<0.000000e+00> : vector<16x96xf32>
    %22 = tpu.matmul %0, %21, %cst_12 {dimension_numbers = #tpu.dot_dimension_numbers<[1], [0], [0], [1], [0, 0, 1, 1], [], []>} : vector<16x16xf32>, vector<16x96xf32>, vector<16x96xf32> -> vector<16x96xf32>
    %23 = vector.broadcast %3 : vector<1x96xf32> to vector<16x96xf32>
    %24 = arith.addf %22, %23 : vector<16x96xf32>
    %cst_13 = arith.constant 0.000000e+00 : f32
    %25 = vector.broadcast %cst_13 : f32 to vector<16x96xf32>
    %26 = arith.maximumf %24, %25 : vector<16x96xf32>
    %cst_14 = arith.constant dense<0.000000e+00> : vector<16x96xf32>
    %27 = tpu.matmul %26, %11, %cst_14 {dimension_numbers = #tpu.dot_dimension_numbers<[1], [0], [0], [1], [0, 0, 1, 1], [], []>} : vector<16x96xf32>, vector<96x96xf32>, vector<16x96xf32> -> vector<16x96xf32>
    %cst_15 = arith.constant dense<0.000000e+00> : vector<16x96xf32>
    %28 = tpu.matmul %0, %27, %cst_15 {dimension_numbers = #tpu.dot_dimension_numbers<[1], [0], [0], [1], [0, 0, 1, 1], [], []>} : vector<16x16xf32>, vector<16x96xf32>, vector<16x96xf32> -> vector<16x96xf32>
    %29 = vector.broadcast %4 : vector<1x96xf32> to vector<16x96xf32>
    %30 = arith.addf %28, %29 : vector<16x96xf32>
    %c0_16 = arith.constant 0 : index
    %c0_17 = arith.constant 0 : index
    %31 = vector.load %arg5[%c0_16, %c0_17] : memref<2x16xf32, #tpu.memory_space<vmem>>, vector<2x16xf32>
    %cst_18 = arith.constant dense<0.000000e+00> : vector<2x96xf32>
    %32 = tpu.matmul %31, %30, %cst_18 {dimension_numbers = #tpu.dot_dimension_numbers<[1], [0], [0], [1], [0, 0, 1, 1], [], []>} : vector<2x16xf32>, vector<16x96xf32>, vector<2x96xf32> -> vector<2x96xf32>
    %cst_19 = arith.constant dense<0.000000e+00> : vector<2x48xf32>
    %33 = tpu.matmul %32, %12, %cst_19 {dimension_numbers = #tpu.dot_dimension_numbers<[1], [0], [0], [1], [0, 0, 1, 1], [], []>} : vector<2x96xf32>, vector<96x48xf32>, vector<2x48xf32> -> vector<2x48xf32>
    %34 = vector.broadcast %5 : vector<1x48xf32> to vector<2x48xf32>
    %35 = arith.addf %33, %34 : vector<2x48xf32>
    %36 = vector.extract_strided_slice %35 {offsets = [0, 0], sizes = [2, 16], strides = [1, 1]} : vector<2x48xf32> to vector<2x16xf32>
    %37 = vector.extract_strided_slice %35 {offsets = [0, 16], sizes = [2, 16], strides = [1, 1]} : vector<2x48xf32> to vector<2x16xf32>
    %38 = vector.extract_strided_slice %35 {offsets = [0, 32], sizes = [2, 16], strides = [1, 1]} : vector<2x48xf32> to vector<2x16xf32>
    %39 = arith.subf %36, %37 : vector<2x16xf32>
    %cst_20 = arith.constant 9.99999997E-7 : f32
    %40 = vector.broadcast %cst_20 : f32 to vector<2x16xf32>
    %41 = arith.addf %39, %40 : vector<2x16xf32>
    %42 = arith.mulf %41, %41 : vector<2x16xf32>
    %cst_21 = arith.constant dense<0.000000e+00> : vector<2xf32>
    %43 = vector.multi_reduction <add>, %42, %cst_21 [1] : vector<2x16xf32> to vector<2xf32>
    %44 = vector.shape_cast %43 : vector<2xf32> to vector<2x1xf32>
    %45 = math.sqrt %44 : vector<2x1xf32>
    %46 = arith.subf %36, %38 : vector<2x16xf32>
    %cst_22 = arith.constant 9.99999997E-7 : f32
    %47 = vector.broadcast %cst_22 : f32 to vector<2x16xf32>
    %48 = arith.addf %46, %47 : vector<2x16xf32>
    %49 = arith.mulf %48, %48 : vector<2x16xf32>
    %cst_23 = arith.constant dense<0.000000e+00> : vector<2xf32>
    %50 = vector.multi_reduction <add>, %49, %cst_23 [1] : vector<2x16xf32> to vector<2xf32>
    %51 = vector.shape_cast %50 : vector<2xf32> to vector<2x1xf32>
    %52 = math.sqrt %51 : vector<2x1xf32>
    %53 = vector.broadcast %6 : vector<1x16xf32> to vector<2x16xf32>
    %54 = arith.mulf %36, %53 : vector<2x16xf32>
    %cst_24 = arith.constant dense<0.000000e+00> : vector<2xf32>
    %55 = vector.multi_reduction <add>, %54, %cst_24 [1] : vector<2x16xf32> to vector<2xf32>
    %56 = vector.shape_cast %55 : vector<2xf32> to vector<2x1xf32>
    %57 = vector.broadcast %7 : vector<1x16xf32> to vector<2x16xf32>
    %58 = arith.mulf %37, %57 : vector<2x16xf32>
    %cst_25 = arith.constant dense<0.000000e+00> : vector<2xf32>
    %59 = vector.multi_reduction <add>, %58, %cst_25 [1] : vector<2x16xf32> to vector<2xf32>
    %60 = vector.shape_cast %59 : vector<2xf32> to vector<2x1xf32>
    %61 = arith.addf %56, %60 : vector<2x1xf32>
    %62 = vector.broadcast %8 : vector<1x1xf32> to vector<2x1xf32>
    %63 = arith.addf %61, %62 : vector<2x1xf32>
    %64 = vector.broadcast %7 : vector<1x16xf32> to vector<2x16xf32>
    %65 = arith.mulf %38, %64 : vector<2x16xf32>
    %cst_26 = arith.constant dense<0.000000e+00> : vector<2xf32>
    %66 = vector.multi_reduction <add>, %65, %cst_26 [1] : vector<2x16xf32> to vector<2xf32>
    %67 = vector.shape_cast %66 : vector<2xf32> to vector<2x1xf32>
    %68 = arith.addf %56, %67 : vector<2x1xf32>
    %69 = vector.broadcast %8 : vector<1x1xf32> to vector<2x1xf32>
    %70 = arith.addf %68, %69 : vector<2x1xf32>
    %71 = arith.negf %63 : vector<2x1xf32>
    %72 = math.exp %71 : vector<2x1xf32>
    %cst_27 = arith.constant 1.000000e+00 : f32
    %73 = vector.broadcast %cst_27 : f32 to vector<2x1xf32>
    %74 = arith.addf %73, %72 : vector<2x1xf32>
    %75 = arith.divf %73, %74 : vector<2x1xf32>
    %76 = arith.negf %70 : vector<2x1xf32>
    %77 = math.exp %76 : vector<2x1xf32>
    %cst_28 = arith.constant 1.000000e+00 : f32
    %78 = vector.broadcast %cst_28 : f32 to vector<2x1xf32>
    %79 = arith.addf %78, %77 : vector<2x1xf32>
    %80 = arith.divf %78, %79 : vector<2x1xf32>
    %81 = tpu.concatenate %35, %45, %52, %75, %80 in 1 : vector<2x48xf32>, vector<2x1xf32>, vector<2x1xf32>, vector<2x1xf32>, vector<2x1xf32> -> vector<2x52xf32>
    %c0_29 = arith.constant 0 : index
    %c0_30 = arith.constant 0 : index
    %82 = vector.load %arg7[%c0_29, %c0_30] : memref<2x52xf32, #tpu.memory_space<vmem>>, vector<2x52xf32>
    tpu.vector_store %arg7[%c0_29, %c0_30], %81 {strides = array<i32>} : memref<2x52xf32, #tpu.memory_space<vmem>>, vector<2x52xf32>,
    return
  }
  func.func @transform_0(%arg0: i32) -> (i32, i32) {
    %c0_i32 = arith.constant 0 : i32
    %c0_i32_0 = arith.constant 0 : i32
    %c0_i32_1 = arith.constant 0 : i32
    return %c0_i32, %c0_i32_0 : i32, i32
  }
  func.func @transform_1(%arg0: i32) -> (i32, i32) {
    %c0_i32 = arith.constant 0 : i32
    %c0_i32_0 = arith.constant 0 : i32
    %c0_i32_1 = arith.constant 0 : i32
    return %c0_i32, %c0_i32_0 : i32, i32
  }
  func.func @transform_2(%arg0: i32) -> (i32, i32) {
    %c0_i32 = arith.constant 0 : i32
    %c0_i32_0 = arith.constant 0 : i32
    %c0_i32_1 = arith.constant 0 : i32
    return %c0_i32, %c0_i32_0 : i32, i32
  }
  func.func @transform_3(%arg0: i32) -> (i32, i32) {
    %c0_i32 = arith.constant 0 : i32
    %c0_i32_0 = arith.constant 0 : i32
    %c0_i32_1 = arith.constant 0 : i32
    return %c0_i32, %c0_i32_0 : i32, i32
  }
  func.func @transform_4(%arg0: i32) -> (i32, i32) {
    %c0_i32 = arith.constant 0 : i32
    %c0_i32_0 = arith.constant 0 : i32
    %c0_i32_1 = arith.constant 0 : i32
    return %c0_i32, %c0_i32_0 : i32, i32
  }
  func.func @transform_5(%arg0: i32) -> (i32, i32) {
    %c0_i32 = arith.constant 0 : i32
    %c0_i32_0 = arith.constant 0 : i32
    %c0_i32_1 = arith.constant 0 : i32
    return %c0_i32, %c0_i32_0 : i32, i32
  }
  func.func @transform_6(%arg0: i32) -> (i32, i32) {
    %c0_i32 = arith.constant 0 : i32
    %c0_i32_0 = arith.constant 0 : i32
    %c0_i32_1 = arith.constant 0 : i32
    return %c0_i32, %c0_i32_0 : i32, i32
  }
}

</mosaic_0001>

<bundles_post_ra>
// kernel: gcn_triplet_forward.1
= control target key start
LH: loop header
LB: loop body
LE: loop exit
PB: predicated region body
PF: predicated region fallthrough
CT: control target
= control target key end

     0   :  { %vm92_vm0 = vcmask 1043456   ;;  %vm52_vm1 = vcmask 130048   ;;  %vm85_vm2 = vcmask 97280   ;;  %s675_s15 = smov 32   ;;  %vm121_vm3 = vcmask 785408   ;;  %s679_s7 = smov 112   ;;  %s953_s1 = inlined_call_operand.vmem [shape: f32[16,12], index: 1, kind: input, shape index: {}]   ;;  %s954_s0 = inlined_call_operand.vmem [shape: f32[16,16], index: 0, kind: input, shape index: {}]   ;;  %s955_s2 = inlined_call_operand.vmem [shape: f32[12,96], index: 2, kind: input, shape index: {}]   ;;  %s956_s3 = inlined_call_operand.vmem [shape: f32[96,240], index: 3, kind: input, shape index: {}]   ;;  %s957_s5 = inlined_call_operand.vmem [shape: f32[8,128], index: 5, kind: input, shape index: {}]   ;;  %s958_s4 = inlined_call_operand.vmem [shape: f32[2,16], index: 4, kind: input, shape index: {}]   ;;  %s959_s6 = inlined_call_operand.vmem [shape: f32[2,52], index: 6, kind: output, shape index: {}]  }
   0x1   :  { %v51_v0 = vld [vmem:[%s953_s1 + $0x8] sm:$0xff]  ;;  %v50_v1 = vld [vmem:[%s953_s1] sm:$0xff]  ;;  %v48_v6 = vld [vmem:[%s956_s3 + $0xb0] sm:$0xff]  ;;  %vm249_vm4 = vcmask 261120   ;;  %s677_s1 = smov 16   ;;  %vm418_vm5 = vcmask 123904  }
   0x2   :  { %73 = vmatpush.msra.mxu0 %v51_v0  ;;  %v726_v2 = vld [vmem:[%s954_s0] sm:$0xff]  ;;  %v83_v3 = vld [vmem:[%s955_s2 + $0x8] sm:$0xf]  ;;  %132 = vmatpush.msra.mxu2 %v48_v6  ;;  %v44_v8 = vld [vmem:[%s956_s3 + $0x90] sm:$0xff]  ;;  %s680_s8 = smov 50   ;;  %s681_s9 = smov 51  }
   0x3   :  { %551 = vmatpush.msk.msra.mxu3 %vm92_vm0, %v83_v3  ;;  %v736_v4 = vld [vmem:[%s954_s0 + $0x8] sm:$0xff]  ;;  %v82_v5 = vld [vmem:[%s955_s2] sm:$0xff]  ;;  %v755_v9 = vld [vmem:[%s956_s3 + $0x58] sm:$0xff] }
   0x4   :  { %74 = vmatpush.msra.mxu0 %v50_v1  ;;  %v46_v7 = vld [vmem:[%s956_s3 + $0xa0] sm:$0xff]  ;;  %v760_v10 = vld [vmem:[%s956_s3 + $0x48] sm:$0xff]  ;;  %v770_v13 = vld [vmem:[%s956_s3 + $0x70] sm:$0xff] }
   0x5   :  { %549 = vmatmul.msk.f32.vlgmr.msra.gmra.mxu0 %vm52_vm1, %v726_v2  ;;  %111 = vmatpush.msra.mxu3 %v82_v5  ;;  %v42_v11 = vld [vmem:[%s956_s3 + $0x80] sm:$0xff]  ;;  %v648_v12 = vpack.i.bf16 %v760_v10, %v755_v9  ;;  %v36_v15 = vld [vmem:[%s956_s3 + $0x50] sm:$0xff]  ;;  %v800_v22 = vld [vmem:[%s956_s3 + $0x18] sm:$0xff] }
   0x6   :  { %133 = vmatpush.msra.mxu2 %v46_v7  ;;  %v775_v14 = vld [vmem:[%s956_s3 + $0x60] sm:$0xff]  ;;  %v788_v17 = vld [vmem:[%s956_s3 + $0x30] sm:$0xff]  ;;  %v805_v23 = vld [vmem:[%s956_s3 + $0x8] sm:$0xff]  ;;  %v603_v35 = vpack.i.bf16 %v755_v9, %v36_v15 }
   0x7   :  { %v34_v16 = vld [vmem:[%s956_s3 + $0x40] sm:$0xff]  ;;  %v28_v21 = vld [vmem:[%s956_s3 + $0x10] sm:$0xff]  ;;  %v658_v24 = vpack.i.bf16 %v805_v23, %v800_v22  ;;  %v815_v26 = vld [vmem:[%s956_s3 + $0xb8] sm:$0xff] }
   0x8   :  { %134 = vmatpush.msra.mxu2 %v44_v8  ;;  %v30_v20 = vld [vmem:[%s956_s3 + $0x20] sm:$0xff]  ;;  %v820_v27 = vld [vmem:[%s956_s3 + $0x98] sm:$0xff]  ;;  %v573_v28 = vpack.i.bf16 %v815_v26, %v48_v6  ;;  %v829_v30 = vld [vmem:[%s956_s3 + $0xa8] sm:$0xff]  ;;  %v608_v36 = vpack.i.bf16 %v760_v10, %v34_v16  ;;  %v623_v43 = vpack.i.bf16 %v800_v22, %v28_v21 }
   0x9   :  { %v26_v25 = vld [vmem:[%s956_s3] sm:$0xff]  ;;  %v583_v29 = vpack.i.bf16 %v820_v27, %v44_v8  ;;  %v834_v31 = vld [vmem:[%s956_s3 + $0x88] sm:$0xff]  ;;  %v578_v32 = vpack.i.bf16 %v829_v30, %v46_v7  ;;  %v864_v47 = vld [vmem:[%s956_s3 + $0x78] sm:$0xff] }
   0xa   :  { %135 = vmatpush.msra.mxu2 %v42_v11  ;;  %574 = vrot.lane.b32.xlu0 %v573_v28, %s675_s15  ;;  %v588_v33 = vpack.i.bf16 %v834_v31, %v42_v11  ;;  %v843_v34 = vld [vmem:[%s957_s5] sm:$0xff]  ;;  %v853_v40 = vld [vmem:[%s956_s3 + $0x28] sm:$0xff]  ;;  %v593_v49 = vpack.i.bf16 %v864_v47, %v770_v13  ;;  %v882_v59 = vld [vmem:[%s956_s3 + $0x38] sm:$0xff]  ;;  %v628_v63 = vpack.i.bf16 %v805_v23, %v26_v25 }
   0xb   :  { %584 = vrot.lane.b32.xlu1 %v583_v29, %s675_s15  ;;  %v84_v37 = vperm.slane %v843_v34, 0  ;;  %v618_v42 = vpack.i.bf16 %v853_v40, %v30_v20  ;;  %v873_v53 = vld [vmem:[%s956_s3 + $0x68] sm:$0xff]  ;;  %v613_v61 = vpack.i.bf16 %v882_v59, %v788_v17  ;;  %s676_s3 = smov 64  }
   0xc   :  { %136 = vmatpush.msra.mxu2 %v770_v13  ;;  %594 = vrot.lane.b32.xlu2 %v593_v49, %s675_s15  ;;  %v598_v54 = vpack.i.bf16 %v873_v53, %v775_v14 }
   0xd   :  { %550 = vmatmul.msk.f32.gmra.mxu0 %vm52_vm1, %v736_v4 }
   0xe   :  { %137 = vmatpush.msra.mxu2 %v775_v14 }
  0x10   :  { %138 = vmatpush.msra.mxu2 %v36_v15 }
  0x12   :  { %139 = vmatpush.msra.mxu2 %v34_v16  ;;  %579 = vrot.lane.b32.xlu0 %v578_v32, %s675_s15 }
  0x13   :  { %589 = vrot.lane.b32.xlu1 %v588_v33, %s675_s15 }
  0x14   :  { %140 = vmatpush.msra.mxu2 %v788_v17  ;;  %599 = vrot.lane.b32.xlu2 %v598_v54, %s675_s15 }
  0x16   :  { %141 = vmatpush.msra.mxu2 %v30_v20 }
  0x18   :  { %142 = vmatpush.msra.mxu2 %v28_v21 }
  0x1a   :  { %143 = vmatpush.msra.mxu2 %v26_v25  ;;  %604 = vrot.lane.b32.xlu0 %v603_v35, %s675_s15 }
  0x1b   :  { %609 = vrot.lane.b32.xlu1 %v608_v36, %s675_s15 }
  0x1c   :  { %614 = vrot.lane.b32.xlu2 %v613_v61, %s675_s15 }
  0x22   :  { %619 = vrot.lane.b32.xlu0 %v618_v42, %s675_s15 }
  0x23   :  { %624 = vrot.lane.b32.xlu1 %v623_v43, %s675_s15 }
  0x24   :  { %629 = vrot.lane.b32.xlu2 %v628_v63, %s675_s15 }
  0x66   :  { %v595_v13 = vpop.permute.xlu2 %594 }
  0x67   :  { %v597_v14 = vunpack.i.h.bf16 %v595_v13  ;;  %v596_v15 = vunpack.i.l.bf16 %v595_v13 }
  0x69   :  { %v257_v16 = vsel %vm249_vm4, %v596_v15, %v597_v14 }
  0x6e   :  { %v600_v21 = vpop.permute.xlu2 %599 }
  0x6f   :  { %v602_v25 = vunpack.i.h.bf16 %v600_v21  ;;  %v601_v28 = vunpack.i.l.bf16 %v600_v21  ;;  %v351_v21 = vperm.slane %v843_v34, 3 }
  0x71   :  { %v256_v33 = vsel %vm249_vm4, %v601_v28, %v602_v25  ;;  %v455_v28 = vperm.slane %v843_v34, 4 }
  0x7c   :  { %v575_v48 = vpop.permute.xlu0 %574 }
  0x7d   :  { %v577_v50 = vunpack.i.h.bf16 %v575_v48  ;;  %v576_v51 = vunpack.i.l.bf16 %v575_v48  ;;  %v585_v0 = vpop.permute.xlu1 %584 }
  0x7e   :  { %v587_v3 = vunpack.i.h.bf16 %v585_v0  ;;  %v586_v5 = vunpack.i.l.bf16 %v585_v0 }
  0x7f   :  { %v261_v52 = vsel %vm249_vm4, %v576_v51, %v577_v50 }
  0x80   :  { %284 = vmatpush.msrb.mxu0 %v261_v52  ;;  %v259_v8 = vsel %vm249_vm4, %v586_v5, %v587_v3  ;;  %v638_v3 = vpack.i.bf16 %v834_v31, %v820_v27 }
  0x82   :  { %v76_v18 = vpop.f32.mrf.mxu0  ;;  %639 = vrot.lane.b32.xlu1 %v638_v3, %s676_s3 }
  0x83   :  { %552 = vmatmul.msk.f32.vlgmr.msra.gmra.mxu3 %vm85_vm2, %v76_v18 }
  0x84   :  { %v580_v55 = vpop.permute.xlu0 %579 }
  0x85   :  { %v582_v56 = vunpack.i.h.bf16 %v580_v55  ;;  %v581_v57 = vunpack.i.l.bf16 %v580_v55  ;;  %v590_v1 = vpop.permute.xlu1 %589 }
  0x86   :  { %v592_v6 = vunpack.i.h.bf16 %v590_v1  ;;  %v591_v7 = vunpack.i.l.bf16 %v590_v1  ;;  %v633_v1 = vpack.i.bf16 %v829_v30, %v815_v26 }
  0x87   :  { %v260_v58 = vsel %vm249_vm4, %v581_v57, %v582_v56  ;;  %v151_v56 = vperm.slane %v843_v34, 1 }
  0x88   :  { %285 = vmatpush.msrb.mxu0 %v260_v58  ;;  %v258_v11 = vsel %vm249_vm4, %v591_v7, %v592_v6  ;;  %v643_v6 = vpack.i.bf16 %v873_v53, %v864_v47  ;;  %634 = vrot.lane.b32.xlu0 %v633_v1, %s676_s3  ;;  %v653_v7 = vpack.i.bf16 %v853_v40, %v882_v59 }
  0x8a   :  { %v79_v19 = vpop.f32.mrf.mxu0  ;;  %286 = vmatpush.msrb.mxu0 %v259_v8  ;;  %644 = vrot.lane.b32.xlu2 %v643_v6, %s676_s3 }
  0x8b   :  { %553 = vmatmul.msk.f32.gmra.mxu3 %vm85_vm2, %v79_v19  ;;  %654 = vrot.lane.b32.xlu1 %v653_v7, %s676_s3  ;;  %vm535_vm2 = vcmask 392192  }
  0x8c   :  { %287 = vmatpush.msrb.mxu0 %v258_v11  ;;  %v605_v17 = vpop.permute.xlu0 %604  ;;  %v303_v11 = vperm.slane %v843_v34, 2 }
  0x8d   :  { %v610_v18 = vpop.permute.xlu1 %609  ;;  %v607_v19 = vunpack.i.h.bf16 %v605_v17  ;;  %v606_v20 = vunpack.i.l.bf16 %v605_v17  ;;  %v327_v17 = vld [vmem:[%s958_s4] sm:$0x3]  ;;  %s678_s4 = smov 96  }
  0x8e   :  { %288 = vmatpush.msrb.mxu0 %v257_v16  ;;  %v612_v29 = vunpack.i.h.bf16 %v610_v18  ;;  %v611_v32 = vunpack.i.l.bf16 %v610_v18 }
  0x8f   :  { %v255_v35 = vsel %vm249_vm4, %v606_v20, %v607_v19  ;;  %v460_v19 = vperm.slane %v843_v34, 5 }
  0x90   :  { %289 = vmatpush.msrb.mxu0 %v256_v33  ;;  %v254_v36 = vsel %vm249_vm4, %v611_v32, %v612_v29  ;;  %649 = vrot.lane.b32.xlu0 %v648_v12, %s676_s3 }
  0x92   :  { %290 = vmatpush.msrb.mxu0 %v255_v35  ;;  %659 = vrot.lane.b32.xlu2 %v658_v24, %s676_s3 }
  0x93   :  { %476 = vrot.lane.b32.xlu1 %v460_v19, %s675_s15 }
  0x94   :  { %291 = vmatpush.msrb.mxu0 %v254_v36  ;;  %v620_v42 = vpop.permute.xlu0 %619 }
  0x95   :  { %v625_v43 = vpop.permute.xlu1 %624 }
  0x96   :  { %v627_v48 = vunpack.i.h.bf16 %v625_v43  ;;  %v626_v49 = vunpack.i.l.bf16 %v625_v43 }
  0x98   :  { %v251_v54 = vsel %vm249_vm4, %v626_v49, %v627_v48  ;;  %462 = vrot.lane.b32.xlu0 %v460_v19, %s677_s1 }
  0xfa   :  { %v635_v26 = vpop.permute.xlu0 %634 }
  0xfb   :  { %v636_v27 = vunpack.i.l.bf16 %v635_v26  ;;  %v637_v30 = vunpack.i.h.bf16 %v635_v26 }
 0x102   :  { %v650_v10 = vpop.permute.xlu0 %649 }
 0x103   :  { %v652_v22 = vunpack.i.h.bf16 %v650_v10 }
 0x106   :  { %v113_v38 = vpop.f32.mrf.mxu3 }
 0x107   :  { %v114_v39 = vadd.f32 %v113_v38, %v84_v37 }
 0x109   :  { %v119_v41 = vmax.f32 %v114_v39, 0.0 }
 0x10a   :  { %v463_v25 = vpop.permute.xlu0 %462 }
 0x10b   :  { %554 = vmatmul.msk.f32.vlgmr.msra.gmra.mxu2 %vm121_vm3, %v119_v41 }
 0x10e   :  { %v116_v44 = vpop.f32.mrf.mxu3 }
 0x10f   :  { %v117_v45 = vadd.f32 %v116_v44, %v84_v37  ;;  %v615_v37 = vpop.permute.xlu2 %614  ;;  %v622_v44 = vunpack.i.h.bf16 %v620_v42 }
 0x110   :  { %v617_v38 = vunpack.i.h.bf16 %v615_v37  ;;  %v616_v39 = vunpack.i.l.bf16 %v615_v37 }
 0x111   :  { %v120_v46 = vmax.f32 %v117_v45, 0.0  ;;  %v621_v45 = vunpack.i.l.bf16 %v620_v42 }
 0x112   :  { %v253_v41 = vsel %vm249_vm4, %v616_v39, %v617_v38 }
 0x113   :  { %555 = vmatmul.msk.f32.gmra.mxu2 %vm121_vm3, %v120_v46  ;;  %292 = vmatpush.msrb.mxu0 %v253_v41  ;;  %v252_v52 = vsel %vm249_vm4, %v621_v45, %v622_v44  ;;  %v474_v44 = vperm.slane %v843_v34, 6 }
 0x115   :  { %293 = vmatpush.msrb.mxu0 %v252_v52 }
 0x117   :  { %v630_v46 = vpop.permute.xlu2 %629  ;;  %294 = vmatpush.msrb.mxu0 %v251_v54 }
 0x118   :  { %v632_v50 = vunpack.i.h.bf16 %v630_v46  ;;  %v631_v51 = vunpack.i.l.bf16 %v630_v46 }
 0x11a   :  { %v250_v55 = vsel %vm249_vm4, %v631_v51, %v632_v50  ;;  %vm539_vm4 = vcmask 408576  }
 0x11b   :  { %295 = vmatpush.msrb.mxu0 %v250_v55 }
 0x11f   :  { %v645_v47 = vpop.permute.xlu2 %644 }
 0x120   :  { %v646_v9 = vunpack.i.l.bf16 %v645_v47  ;;  %v647_v12 = vunpack.i.h.bf16 %v645_v47 }
 0x127   :  { %v660_v24 = vpop.permute.xlu2 %659 }
 0x128   :  { %v661_v13 = vunpack.i.l.bf16 %v660_v24  ;;  %v662_v18 = vunpack.i.h.bf16 %v660_v24 }
 0x18e   :  { %v145_v60 = vpop.f32.mrf.mxu2 }
 0x196   :  { %v148_v62 = vpop.f32.mrf.mxu2 }
 0x197   :  { %166 = vmatpush.msrb.mxu3 %v148_v62 }
 0x199   :  { %167 = vmatpush.msrb.mxu3 %v145_v60 }
 0x19a   :  { %556 = vmatmul.msk.f32.vlgmr.msrb.gmra.mxu3 %vm52_vm1, %v726_v2 }
 0x1a2   :  { %557 = vmatmul.msk.f32.gmra.mxu3 %vm52_vm1, %v736_v4 }
 0x21d   :  { %v169_v57 = vpop.f32.mrf.mxu3 }
 0x21e   :  { %v170_v58 = vadd.f32 %v169_v57, %v151_v56 }
 0x220   :  { %v175_v60 = vmax.f32 %v170_v58, 0.0 }
 0x222   :  { %558 = vmatmul.msk.f32.vlgmr.msrb.gmra.mxu0 %vm121_vm3, %v175_v60 }
 0x225   :  { %v172_v61 = vpop.f32.mrf.mxu3 }
 0x226   :  { %v173_v62 = vadd.f32 %v172_v61, %v151_v56 }
 0x228   :  { %v176_v63 = vmax.f32 %v173_v62, 0.0 }
 0x22a   :  { %559 = vmatmul.msk.f32.gmra.mxu0 %vm121_vm3, %v176_v63 }
 0x29f   :  { %v297_v0 = vpop.f32.mrf.mxu0 }
 0x2a7   :  { %v300_v5 = vpop.f32.mrf.mxu0 }
 0x2a8   :  { %318 = vmatpush.msra.mxu1 %v300_v5 }
 0x2aa   :  { %319 = vmatpush.msra.mxu1 %v297_v0 }
 0x2ab   :  { %560 = vmatmul.msk.f32.vlgmr.msra.gmra.mxu1 %vm52_vm1, %v726_v2  ;;  %v640_v2 = vpop.permute.xlu1 %639 }
 0x2ac   :  { %395 = vmatpush.msrb.mxu1 %v636_v27  ;;  %v641_v31 = vunpack.i.l.bf16 %v640_v2  ;;  %v642_v40 = vunpack.i.h.bf16 %v640_v2 }
 0x2ae   :  { %396 = vmatpush.msrb.mxu1 %v637_v30 }
 0x2b0   :  { %397 = vmatpush.msrb.mxu1 %v641_v31 }
 0x2b2   :  { %398 = vmatpush.msrb.mxu1 %v642_v40 }
 0x2b3   :  { %561 = vmatmul.msk.f32.gmra.mxu1 %vm52_vm1, %v736_v4  ;;  %v651_v4 = vunpack.i.l.bf16 %v650_v10  ;;  %v655_v59 = vpop.permute.xlu1 %654 }
 0x2b4   :  { %399 = vmatpush.msrb.mxu1 %v646_v9  ;;  %v656_v23 = vunpack.i.l.bf16 %v655_v59  ;;  %v657_v8 = vunpack.i.h.bf16 %v655_v59 }
 0x2b6   :  { %400 = vmatpush.msrb.mxu1 %v647_v12 }
 0x2b8   :  { %401 = vmatpush.msrb.mxu1 %v651_v4 }
 0x2ba   :  { %402 = vmatpush.msrb.mxu1 %v652_v22 }
 0x2bb   :  { %v477_v32 = vpop.permute.xlu1 %476 }
 0x2bc   :  { %403 = vmatpush.msrb.mxu1 %v656_v23 }
 0x2be   :  { %404 = vmatpush.msrb.mxu1 %v657_v8 }
 0x2c0   :  { %405 = vmatpush.msrb.mxu1 %v661_v13 }
 0x2c2   :  { %406 = vmatpush.msrb.mxu1 %v662_v18 }
 0x328   :  { %v321_v53 = vpop.f32.mrf.mxu1 }
 0x329   :  { %v322_v16 = vadd.f32 %v321_v53, %v303_v11 }
 0x330   :  { %v324_v14 = vpop.f32.mrf.mxu1 }
 0x331   :  { %v325_v15 = vadd.f32 %v324_v14, %v303_v11 }
 0x333   :  { %345 = vmatpush.msra.mxu3 %v325_v15 }
 0x335   :  { %346 = vmatpush.msra.mxu3 %v322_v16 }
 0x336   :  { %562 = vmatmul.msk.f32.vlgmr.msra.gmra.mxu3 %vm52_vm1, %v327_v17 }
 0x3b9   :  { %v348_v20 = vpop.f32.mrf.mxu3 }
 0x3ba   :  { %563 = vmatmul.msk.f32.vlgmr.msrb.gmra.mxu1 %vm121_vm3, %v348_v20  ;;  %vm537_vm3 = vcmask 400384  }
 0x437   :  { %v408_v29 = vpop.f32.mrf.mxu1 }
 0x438   :  { %v934_v33 = vadd.f32 %v408_v29, %v351_v21 }
 0x43a   :  { %v465_v35 = vmul.f32 %v463_v25, %v934_v33  ;;  %v479_v36 = vmul.f32 %v477_v32, %v934_v33  ;;  %v456_v37 = vmul.f32 %v455_v28, %v934_v33 }
 0x43c   :  { %481 = vrot.lane.b32.xlu0 %v479_v36, %s678_s4  ;;  %467 = vrot.lane.b32.xlu2 %v465_v35, %s679_s7  ;;  %v457_v38 = vsel %vm418_vm5, %v456_v37, 0.0 }
 0x43d   :  { %458 = vadd.xlane.f32.xlu1 %v457_v38 }
 0x456   :  { %434 = vrot.lane.b32.xlu1 %v934_v33, %s678_s4 }
 0x496   :  { %v468_v39 = vpop.permute.xlu2 %467 }
 0x497   :  { %v470_v41 = vsel %vm418_vm5, %v468_v39, 0.0 }
 0x498   :  { %471 = vadd.xlane.f32.xlu2 %v470_v41 }
 0x4ae   :  { %v482_v42 = vpop.permute.xlu0 %481 }
 0x4af   :  { %v484_v43 = vsel %vm418_vm5, %v482_v42, 0.0 }
 0x4b0   :  { %485 = vadd.xlane.f32.xlu0 %v484_v43  ;;  %412 = vrot.lane.b32.xlu2 %v934_v33, %s679_s7  ;;  %v459_v45 = vpop.xlane.xlu1 %458 }
 0x4c8   :  { %v435_v51 = vpop.permute.xlu1 %434 }
 0x4c9   :  { %v437_v55 = vsub.f32 %v934_v33, %v435_v51 }
 0x4cb   :  { %v438_v61 = vadd.f32 1e-06, %v437_v55 }
 0x4cd   :  { %v439_v34 = vmul.f32 %v438_v61, %v438_v61 }
 0x4cf   :  { %v440_v0 = vsel %vm418_vm5, %v439_v34, 0.0 }
 0x50b   :  { %v472_v46 = vpop.xlane.xlu2 %471 }
 0x50c   :  { %v473_v48 = vadd.f32 %v472_v46, %v459_v45 }
 0x50e   :  { %v475_v49 = vadd.f32 %v474_v44, %v473_v48 }
 0x510   :  { %v564_v50 = vmul.f32 -1.442695, %v475_v49 }
 0x512   :  { %663 = vpow2.f32 %v564_v50 }
 0x513   :  { %v413_v52 = vpop.permute.xlu2 %412 }
 0x514   :  { %v415_v54 = vsub.f32 %v934_v33, %v413_v52 }
 0x516   :  { %v416_v56 = vadd.f32 1e-06, %v415_v54 }
 0x518   :  { %v664_v57 = vpop.eup %663  ;;  %v417_v58 = vmul.f32 %v416_v56, %v416_v56 }
 0x519   :  { %v492_v60 = vadd.f32 1.0, %v664_v57 }
 0x51a   :  { %v419_v62 = vsel %vm418_vm5, %v417_v58, 0.0  ;;  %vm541_vm5 = vcmask 416768  }
 0x51b   :  { %665 = vrcp.f32 %v492_v60  ;;  %420 = vadd.xlane.f32.xlu0 %v419_v62  ;;  %v504_v7 = vand.u32 2147483648, %v492_v60  ;;  %v502_v2 = vand.u32 2147483647, %v492_v60  ;;  %vm498_vm7 = vweird.f32 %v492_v60 }
 0x51d   :  { %v505_v47 = vor.u32 1.1754944e-38, %v504_v7  ;;  %vm503_vm9 = vcmp.eq.f32.partialorder %v502_v2, 8.507059e+37 }
 0x521   :  { %v666_v63 = vpop.eup %665 }
 0x522   :  { %v494_v1 = vmul.f32 %v666_v63, %v492_v60  ;;  %vm499_vm6 = vweird.f32 %v666_v63 }
 0x523   :  { %v486_v3 = vpop.xlane.xlu0 %485  ;;  %441 = vadd.xlane.f32.xlu0 %v440_v0  ;;  %vm500_vm8 = vmor %vm498_vm7, %vm499_vm6  ;;  %vm543_vm6 = vcmask 418816  }
 0x524   :  { %v487_v5 = vadd.f32 %v486_v3, %v459_v45  ;;  %v495_v6 = vsub.f32 1.0, %v494_v1 }
 0x526   :  { %v488_v26 = vadd.f32 %v487_v5, %v474_v44  ;;  %v496_v27 = vmul.f32 %v666_v63, %v495_v6 }
 0x528   :  { %v565_v30 = vmul.f32 -1.442695, %v488_v26  ;;  %v497_v31 = vadd.f32 %v666_v63, %v496_v27 }
 0x52a   :  { %667 = vpow2.f32 %v565_v30  ;;  %v501_v40 = vsel %vm500_vm8, %v666_v63, %v497_v31 }
 0x52b   :  { %v506_v9 = vsel %vm503_vm9, %v505_v47, %v501_v40 }
 0x52c   :  { %528 = vrot.lane.b32.xlu2 %v506_v9, %s680_s8 }
 0x530   :  { %v668_v10 = vpop.eup %667 }
 0x531   :  { %v511_v12 = vadd.f32 1.0, %v668_v10 }
 0x533   :  { %669 = vrcp.f32 %v511_v12  ;;  %v523_v22 = vand.u32 2147483648, %v511_v12  ;;  %v521_v24 = vand.u32 2147483647, %v511_v12  ;;  %vm517_vm11 = vweird.f32 %v511_v12 }
 0x535   :  { %v524_v11 = vor.u32 1.1754944e-38, %v523_v22  ;;  %vm522_vm13 = vcmp.eq.f32.partialorder %v521_v24, 8.507059e+37 }
 0x539   :  { %v670_v4 = vpop.eup %669 }
 0x53a   :  { %v513_v53 = vmul.f32 %v670_v4, %v511_v12  ;;  %vm518_vm10 = vweird.f32 %v670_v4 }
 0x53b   :  { %vm519_vm12 = vmor %vm517_vm11, %vm518_vm10 }
 0x53c   :  { %v514_v59 = vsub.f32 1.0, %v513_v53 }
 0x53e   :  { %v515_v23 = vmul.f32 %v670_v4, %v514_v59 }
 0x540   :  { %v516_v8 = vadd.f32 %v670_v4, %v515_v23 }
 0x542   :  { %v520_v13 = vsel %vm519_vm12, %v670_v4, %v516_v8 }
 0x543   :  { %v525_v14 = vsel %vm522_vm13, %v524_v11, %v520_v13 }
 0x544   :  { %532 = vrot.lane.b32.xlu0 %v525_v14, %s681_s9 }
 0x586   :  { %v529_v50 = vpop.permute.xlu2 %528 }
 0x58e   :  { %v421_v15 = vpop.xlane.xlu0 %420 }
 0x58f   :  { %671 = vrsqrt.f32 %v421_v15  ;;  %vm429_vm14 = vcmp.eq.f32.partialorder %v421_v15, inf  ;;  %v432_v42 = vand.u32 2147483648, %v421_v15  ;;  %vm431_vm0 = vcmp.eq.f32.partialorder %v421_v15, 0.0 }
 0x595   :  { %v672_v16 = vpop.eup %671 }
 0x596   :  { %v423_v17 = vmul.f32 %v672_v16, %v421_v15  ;;  %v442_v18 = vpop.xlane.xlu0 %441 }
 0x597   :  { %673 = vrsqrt.f32 %v442_v18  ;;  %vm450_vm15 = vcmp.eq.f32.partialorder %v442_v18, inf  ;;  %v453_v44 = vand.u32 2147483648, %v442_v18  ;;  %vm452_vm1 = vcmp.eq.f32.partialorder %v442_v18, 0.0 }
 0x598   :  { %v424_v19 = vmul.f32 %v672_v16, %v423_v17 }
 0x59a   :  { %v425_v20 = vmul.f32 0.5, %v424_v19 }
 0x59c   :  { %v426_v28 = vsub.f32 1.5, %v425_v20 }
 0x59d   :  { %v674_v21 = vpop.eup %673 }
 0x59e   :  { %v444_v25 = vmul.f32 %v674_v21, %v442_v18  ;;  %v427_v35 = vmul.f32 %v672_v16, %v426_v28 }
 0x5a0   :  { %v445_v29 = vmul.f32 %v674_v21, %v444_v25  ;;  %v428_v38 = vmul.f32 %v427_v35, %v421_v15 }
 0x5a2   :  { %v446_v32 = vmul.f32 0.5, %v445_v29  ;;  %v430_v41 = vsel %vm429_vm14, %v421_v15, %v428_v38 }
 0x5a3   :  { %v433_v45 = vsel %vm431_vm0, %v432_v42, %v430_v41 }
 0x5a4   :  { %v447_v36 = vsub.f32 1.5, %v446_v32  ;;  %v536_v48 = vsel %vm535_vm2, %v934_v33, %v433_v45 }
 0x5a6   :  { %v448_v37 = vmul.f32 %v674_v21, %v447_v36 }
 0x5a8   :  { %v449_v39 = vmul.f32 %v448_v37, %v442_v18 }
 0x5aa   :  { %v451_v43 = vsel %vm450_vm15, %v442_v18, %v449_v39 }
 0x5ab   :  { %v454_v46 = vsel %vm452_vm1, %v453_v44, %v451_v43 }
 0x5ac   :  { %v538_v49 = vsel %vm537_vm3, %v536_v48, %v454_v46 }
 0x5ad   :  { %v540_v51 = vsel %vm539_vm4, %v538_v49, %v529_v50 }
 0x5b6   :  { %v533_v52 = vpop.permute.xlu0 %532 }
 0x5b7   :  { %v542_v54 = vsel %vm541_vm5, %v540_v51, %v533_v52 }
 0x5b8   :  { %544 = vst.msk [vmem:[%s959_s6] sm:$0x3] %vm543_vm6, %v542_v54 }

</bundles_post_ra>
